<compile_context>
chip_gen: v6e
topology: v6e:2x2x1
jax: 0.10.0
libtpu: 0.0.40
codegen_flags: <defaults>
</compile_context>

<pallas_src>
import functools
import math

import jax
import jax.numpy as jnp
from jax.experimental import pallas as pl
from jax.experimental.pallas import tpu as pltpu

B = 2           # batch_size (hard-coded to 2 in the reference forward)
T = 8           # imu sequence length
IMU_DIM = 6     # gyro(3) + accel(3)
HIDDEN = 32     # hidden width of the synthetic noise model (MLP)
NOISE_DIM = 12  # len(imu_noise_log_j)
STATE_DIM = 16  # QNUKF state dimension  (x is [B, 16])
ERR_DIM = 15    # QNUKF error-state covariance dimension (P_k_1 trailing dims)

LOG10 = math.log(10.0)

ACT_COLS = 8    # imu[:, -1, :] zero-padded 6 -> 8 (sublane-aligned contraction)
OUT_COLS = 128  # lane-dense output; noise lives in lanes [0, NOISE_DIM)

# ---- packed static-parameter slab layout: [PARAM_ROWS, PARAM_COLS] f32, zero padded
ROW_W1 = 0                 # rows 0..5  : w1  [6, 32]      (cols 0..31)
ROW_B1 = 6                 # row  6     : b1  [32]         (cols 0..31)
ROW_LOGJ = 7               # row  7     : imu_noise_log_j  (cols 0..11)
ROW_W2 = 8                 # rows 8..39 : w2  [32, 12]     (cols 0..11)
ROW_B2 = ROW_W2 + HIDDEN   # row  40    : b2  [12]         (cols 0..11)
PARAM_ROWS = 48            # padded to a multiple of 8 sublanes
PARAM_COLS = OUT_COLS      # 128 lanes (zero padded -> padded output lanes are 0)


def _noise_model_kernel(scale,        # Python float closure constant: beta * ln(10)
                        acts_ref,     # VMEM [1, B, ACT_COLS]  (cols 6,7 are zero)
                        params_ref,   # VMEM [PARAM_ROWS, PARAM_COLS], resident
                        noise_ref):   # out VMEM [1, B, OUT_COLS]
    imu_last = acts_ref[0, :, :]                                   # [B, 8]

    # Layer-1 weight block includes rows 6,7 (b1 / log_j); they multiply the
    # zero-padded activation columns 6,7 so they cannot affect the result.
    w1_blk = params_ref[ROW_W1:ROW_W1 + ACT_COLS, 0:HIDDEN]        # [8, 32]
    b1 = params_ref[ROW_B1:ROW_B1 + 1, 0:HIDDEN]                   # [1, 32]
    log_j = params_ref[ROW_LOGJ:ROW_LOGJ + 1, :]                   # [1, 128]
    w2 = params_ref[ROW_W2:ROW_W2 + HIDDEN, :]                     # [32, 128]
    b2 = params_ref[ROW_B2:ROW_B2 + 1, :]                          # [1, 128]

    # imu_noise_std = self.model(imu): 2-layer MLP on the last imu sample.
    # Two MXU pushes (f32 accumulate) — the MXU is otherwise idle.
    h = jnp.tanh(jnp.dot(imu_last, w1_blk,
                         preferred_element_type=jnp.float32) + b1)  # [B, 32]
    z = jnp.dot(h, w2, preferred_element_type=jnp.float32) + b2     # [B, 128]

    # noise_vec_std = imu_noise_log_j * 10 ** (beta * tanh(imu_noise_std))
    #               = log_j * exp((beta*ln10) * tanh(z))
    # Padded lanes: log_j == 0 and z == 0, so output lanes [12,128) stay 0 and
    # the store is a dense, unmasked [B, 128] write.
    noise_ref[0, :, :] = log_j * jnp.exp(scale * jnp.tanh(z))


def pack_params(w1, b1, w2, b2, imu_noise_log_j):
    """One-time host-side packing of the static parameters into a single slab."""
    slab = jnp.zeros((PARAM_ROWS, PARAM_COLS), jnp.float32)
    slab = slab.at[ROW_W1:ROW_W1 + IMU_DIM, 0:HIDDEN].set(w1.astype(jnp.float32))
    slab = slab.at[ROW_B1, 0:HIDDEN].set(b1.astype(jnp.float32))
    slab = slab.at[ROW_LOGJ, 0:NOISE_DIM].set(imu_noise_log_j.astype(jnp.float32))
    slab = slab.at[ROW_W2:ROW_W2 + HIDDEN, 0:NOISE_DIM].set(w2.astype(jnp.float32))
    slab = slab.at[ROW_B2, 0:NOISE_DIM].set(b2.astype(jnp.float32))
    return slab


def make_loss_wrapper(param_slab, beta):
    """Returns (forward_steps, forward).

    imu_noise_log_j is baked into `param_slab` (pack_params) and beta*ln(10)
    into the kernel closure, so the kernel has exactly 2 inputs / 1 output.
    """
    scale = float(beta) * LOG10
    kernel = functools.partial(_noise_model_kernel, scale)

    def _noise_vec_std(imu_seq):
        """[S, B, T, 6] -> [S, B, NOISE_DIM] with one gridded pallas_call."""
        n_steps = imu_seq.shape[0]
        imu_last = imu_seq[:, :, -1, :].astype(jnp.float32)          # [S, B, 6]
        acts = jnp.pad(imu_last, ((0, 0), (0, 0), (0, ACT_COLS - IMU_DIM)))

        noise_padded = pl.pallas_call(
            kernel,
            grid=(n_steps,),
            in_specs=[
                # per-step activation block, streamed / double-buffered
                pl.BlockSpec((1, B, ACT_COLS), lambda i: (i, 0, 0)),
                # parameter slab: same block every step -> VMEM-resident, 1 DMA
                pl.BlockSpec((PARAM_ROWS, PARAM_COLS), lambda i: (0, 0)),
            ],
            out_specs=pl.BlockSpec((1, B, OUT_COLS), lambda i: (i, 0, 0)),
            out_shape=jax.ShapeDtypeStruct((n_steps, B, OUT_COLS), jnp.float32),
            compiler_params=pltpu.CompilerParams(
                # v7x: shard the step axis across its 2 TCs; no-op on v5e/v6e.
                dimension_semantics=("parallel",)),
            cost_estimate=pl.CostEstimate(
                flops=2 * n_steps * B * (ACT_COLS * HIDDEN + HIDDEN * OUT_COLS),
                transcendentals=n_steps * B * (HIDDEN + 2 * OUT_COLS),
                bytes_accessed=4 * (PARAM_ROWS * PARAM_COLS
                                    + n_steps * B * (ACT_COLS + OUT_COLS)),
            ),
        )(acts, param_slab)
        return noise_padded[:, :, :NOISE_DIM]                       # [S, B, 12]

    @jax.jit
    def forward_steps(imu_seq, target_seq, xhat_seq, P_seq):
        """Many filter steps at once: returns (per-step loss [S], x, noise)."""
        del P_seq  # consumed only by the stubbed QNUKF predict step
        noise_vec_std = _noise_vec_std(imu_seq)

        # TODO(synk): QNUKF(xhat_k_1[i][-1], P_k_1[i][-1]).predict(...) is an
        # external quaternion-UKF class not defined in the reference module; the
        # state is passed through unchanged (x == xhat_k_1[:, -1, :]) instead of
        # the UKF prediction, so the MSE below is against the un-propagated state.
        x = xhat_seq[:, :, -1, :].astype(jnp.float32)                # [S, B, 16]
        diff = x - target_seq.astype(jnp.float32)
        loss = jnp.mean(diff * diff, axis=(1, 2))  # data-independent; XLA fuses it
        return loss, x, noise_vec_std

    @jax.jit
    def forward(imu, target, xhat_k_1, P_k_1):
        """Single-step forward matching LossWrapper.forward (returns scalar loss)."""
        loss, _, _ = forward_steps(imu[None], target[None],
                                   xhat_k_1[None], P_k_1[None])
        return loss[0]

    return forward_steps, forward


def _reference(imu_seq, target_seq, xhat_seq, w1, b1, w2, b2, log_j, beta):
    """Pure-JAX reference of the same (stubbed-UKF) forward."""
    imu_last = imu_seq[:, :, -1, :]
    h = jnp.tanh(imu_last @ w1 + b1)
    z = h @ w2 + b2
    noise = log_j * (10.0 ** (beta * jnp.tanh(z)))
    x = xhat_seq[:, :, -1, :]
    loss = jnp.mean((x - target_seq) ** 2, axis=(1, 2))
    return loss, x, noise


if __name__ == "__main__":
    key = jax.random.PRNGKey(0)
    ks = jax.random.split(key, 8)

    S = 8  # number of filter steps fused into one pallas_call

    imu_seq = jax.random.normal(ks[0], (S, B, T, IMU_DIM), jnp.float32)
    target_seq = jax.random.normal(ks[1], (S, B, STATE_DIM), jnp.float32)
    xhat_seq = jax.random.normal(ks[2], (S, B, T, STATE_DIM), jnp.float32)
    P_seq = 0.01 * jax.random.normal(ks[3], (S, B, T, ERR_DIM, ERR_DIM), jnp.float32)
    imu_noise_log_j = 0.1 * jnp.abs(jax.random.normal(ks[4], (NOISE_DIM,), jnp.float32))
    beta = 0.5

    # Deterministic synthetic model parameters (self.model = MLP 6 -> 32 -> 12).
    w1 = 0.1 * jax.random.normal(ks[5], (IMU_DIM, HIDDEN), jnp.float32)
    b1 = jnp.zeros((HIDDEN,), jnp.float32)
    w2 = 0.1 * jax.random.normal(ks[6], (HIDDEN, NOISE_DIM), jnp.float32)
    b2 = jnp.zeros((NOISE_DIM,), jnp.float32)

    # One-time parameter pack (amortized across all steps).
    param_slab = pack_params(w1, b1, w2, b2, imu_noise_log_j)
    forward_steps, forward = make_loss_wrapper(param_slab, beta)

    # Gridded multi-step call (the fast path) + single-step reference-signature call.
    losses, x, noise = forward_steps(imu_seq, target_seq, xhat_seq, P_seq)
    loss0 = forward(imu_seq[0], target_seq[0], xhat_seq[0], P_seq[0])
    jax.block_until_ready((losses, x, noise, loss0))

    # Correctness check against a pure-JAX reference of the same forward.
    ref_loss, ref_x, ref_noise = _reference(
        imu_seq, target_seq, xhat_seq, w1, b1, w2, b2, imu_noise_log_j, beta)
    assert float(jnp.max(jnp.abs(losses - ref_loss))) < 1e-4
    assert float(jnp.max(jnp.abs(x - ref_x))) < 1e-4
    assert float(jnp.max(jnp.abs(noise - ref_noise))) < 1e-4
    assert float(jnp.abs(loss0 - ref_loss[0])) < 1e-4

    print("KERNEL_OK")
</pallas_src>

<mosaic_0001>
module attributes {stable_mosaic.version = 11 : i64} {
  func.func @_noise_model_kernel(%arg0: i32, %arg1: memref<1x2x8xf32, #tpu.memory_space<vmem>>, %arg2: memref<48x128xf32, #tpu.memory_space<vmem>>, %arg3: memref<1x2x128xf32, #tpu.memory_space<vmem>>) attributes {dimension_semantics = [#tpu.dimension_semantics<parallel>], iteration_bounds = array<i64: 8>, scalar_prefetch = 0 : i64, scratch_operands = 0 : i64, tpu.core_type = #tpu.core_type<tc>, window_params = [{transform_indices = @transform_0, window_bounds = array<i64: 1, 2, 8>}, {pipeline_mode = #tpu.pipeline_mode<synchronous>, transform_indices = @transform_1, window_bounds = array<i64: 48, 128>}, {transform_indices = @transform_2, window_bounds = array<i64: 1, 2, 128>}]} {
    %c0 = arith.constant 0 : index
    %c0_0 = arith.constant 0 : index
    %c0_1 = arith.constant 0 : index
    %0 = vector.load %arg1[%c0, %c0_0, %c0_1] : memref<1x2x8xf32, #tpu.memory_space<vmem>>, vector<1x2x8xf32>
    %1 = vector.shape_cast %0 : vector<1x2x8xf32> to vector<2x8xf32>
    %c0_2 = arith.constant 0 : index
    %c0_3 = arith.constant 0 : index
    %2 = vector.load %arg2[%c0_2, %c0_3] : memref<48x128xf32, #tpu.memory_space<vmem>>, vector<8x32xf32>
    %c6 = arith.constant 6 : index
    %c0_4 = arith.constant 0 : index
    %3 = vector.load %arg2[%c6, %c0_4] : memref<48x128xf32, #tpu.memory_space<vmem>>, vector<1x32xf32>
    %c7 = arith.constant 7 : index
    %c0_5 = arith.constant 0 : index
    %4 = vector.load %arg2[%c7, %c0_5] : memref<48x128xf32, #tpu.memory_space<vmem>>, vector<1x128xf32>
    %c8 = arith.constant 8 : index
    %c0_6 = arith.constant 0 : index
    %5 = vector.load %arg2[%c8, %c0_6] : memref<48x128xf32, #tpu.memory_space<vmem>>, vector<32x128xf32>
    %c40 = arith.constant 40 : index
    %c0_7 = arith.constant 0 : index
    %6 = vector.load %arg2[%c40, %c0_7] : memref<48x128xf32, #tpu.memory_space<vmem>>, vector<1x128xf32>
    %cst = arith.constant dense<0.000000e+00> : vector<2x32xf32>
    %7 = tpu.matmul %1, %2, %cst {dimension_numbers = #tpu.dot_dimension_numbers<[1], [0], [0], [1], [0, 0, 1, 1], [], []>} : vector<2x8xf32>, vector<8x32xf32>, vector<2x32xf32> -> vector<2x32xf32>
    %8 = vector.broadcast %3 : vector<1x32xf32> to vector<2x32xf32>
    %9 = arith.addf %7, %8 : vector<2x32xf32>
    %10 = math.tanh %9 : vector<2x32xf32>
    %cst_8 = arith.constant dense<0.000000e+00> : vector<2x128xf32>
    %11 = tpu.matmul %10, %5, %cst_8 {dimension_numbers = #tpu.dot_dimension_numbers<[1], [0], [0], [1], [0, 0, 1, 1], [], []>} : vector<2x32xf32>, vector<32x128xf32>, vector<2x128xf32> -> vector<2x128xf32>
    %12 = vector.broadcast %6 : vector<1x128xf32> to vector<2x128xf32>
    %13 = arith.addf %11, %12 : vector<2x128xf32>
    %14 = math.tanh %13 : vector<2x128xf32>
    %cst_9 = arith.constant 1.15129256 : f32
    %15 = vector.broadcast %cst_9 : f32 to vector<2x128xf32>
    %16 = arith.mulf %15, %14 : vector<2x128xf32>
    %17 = math.exp %16 : vector<2x128xf32>
    %18 = vector.broadcast %4 : vector<1x128xf32> to vector<2x128xf32>
    %19 = arith.mulf %18, %17 : vector<2x128xf32>
    %c0_10 = arith.constant 0 : index
    %c0_11 = arith.constant 0 : index
    %c0_12 = arith.constant 0 : index
    %20 = vector.load %arg3[%c0_10, %c0_11, %c0_12] : memref<1x2x128xf32, #tpu.memory_space<vmem>>, vector<1x2x128xf32>
    %21 = vector.shape_cast %20 : vector<1x2x128xf32> to vector<2x128xf32>
    %22 = vector.shape_cast %19 : vector<2x128xf32> to vector<1x2x128xf32>
    tpu.vector_store %arg3[%c0_10, %c0_11, %c0_12], %22 {strides = array<i32>} : memref<1x2x128xf32, #tpu.memory_space<vmem>>, vector<1x2x128xf32>,
    return
  }
  func.func @transform_0(%arg0: i32) -> (i32, i32, i32) {
    %c0_i32 = arith.constant 0 : i32
    %c0_i32_0 = arith.constant 0 : i32
    %c0_i32_1 = arith.constant 0 : i32
    return %arg0, %c0_i32, %c0_i32_0 : i32, i32, i32
  }
  func.func @transform_1(%arg0: i32) -> (i32, i32) {
    %c0_i32 = arith.constant 0 : i32
    %c0_i32_0 = arith.constant 0 : i32
    %c0_i32_1 = arith.constant 0 : i32
    return %c0_i32, %c0_i32_0 : i32, i32
  }
  func.func @transform_2(%arg0: i32) -> (i32, i32, i32) {
    %c0_i32 = arith.constant 0 : i32
    %c0_i32_0 = arith.constant 0 : i32
    %c0_i32_1 = arith.constant 0 : i32
    return %arg0, %c0_i32, %c0_i32_0 : i32, i32, i32
  }
}

</mosaic_0001>

<bundles_post_ra>
// kernel: forward_steps.1
= control target key start
LH: loop header
LB: loop body
LE: loop exit
PB: predicated region body
PF: predicated region fallthrough
CT: control target
= control target key end

     0   :  { %7 = vsyncpa [#allocation3], 0  ;;  %s664_s0 = inlined_call_operand.vmem [shape: f32[8,2,8], index: 0, kind: input, shape index: {}]   ;;  %s665_s1 = inlined_call_operand.vmem [shape: f32[48,128], index: 1, kind: input, shape index: {}]   ;;  %s666_s2 = inlined_call_operand.hbm [shape: f32[8,2,128], index: 2, kind: output, shape index: {}]  }
   0x1   :  { %9 = vsyncpa [#allocation3 + $0x1], 0  ;;  %s553_s9 = smov 0   ;;  %s555_s10 = smov 0  }
   0x2   :  { %s557_s11 = smov 0   ;;  %s559_s12 = smov 0  }
   0x3 LB: > { %s574_s13 = sadd.s32 4294967295, %s533_s12   ;;  %s388_s14 = sadd.s32 4294967294, %s533_s12   ;;  %s533_s12 = sphi %s559_s12, %s672_s12   ;;  %s529_s11 = sphi %s557_s11, %s671_s11   ;;  %s525_s10 = sphi %s555_s10, %s670_s10   ;;  %s521_s9 = sphi %s553_s9, %s669_s9  }
   0x4   : > { %s578_s15 = sadd.s32 1, %s533_s12   ;;  %s69_s16 = sadd.s32 1, %s529_s11 }
   0x5   : > { %s66_s17 = ssub.s32 %s533_s12, %s578_s15  ;;  %p79_p0 = scmp.ne.s32.totalorder %s529_s11, %s525_s10 }
   0x6   : > { %p67_p1 = scmp.eq.s32.totalorder %s66_s17, 0  ;;  %p80_p2 = scmp.eq.s32.totalorder %s574_s13, 7 }
   0x7   : > { %p85_p3 = scmp.ne.s32.totalorder %s525_s10, %s521_s9  ;;  %p86_p4 = scmp.eq.s32.totalorder %s388_s14, 7 }
   0x8   : > { %s589_s18 = scalar_select %p67_p1, %s529_s11, %s69_s16  }
   0x9   : > { %p591_p5 = por %p80_p2, %p79_p0  ;;  %p595_p6 = por %p86_p4, %p85_p3 }
   0xa   : > { %p391_p7 = scmp.ge.s32.totalorder %s533_s12, 1  ;;  %p114_p8 = scmp.lt.s32.totalorder %s533_s12, 9 }
   0xc   : > { %p115_p9 = pnand %p391_p7, %p114_p8 }
   0xd   : > { %p135_p10 = scmp.lt.s32.totalorder (!%p115_p9), %s574_s13, 7  ;;  %s132_s21 = sand.u32 (!%p115_p9), 1, %s525_s10  }
   0xe   : > { %118 = sbr.rel (%p115_p9) target bundleno = 475 (0x1db), region = 28  ;;  %s392_s22 = sshll.u32 (!%p115_p9), %s132_s21, 1 }
   0xf   : > { %s400_s25 = sshll.u32 (!%p115_p9), %s574_s13, 5  ;;  %s134_s26 = scalar_lea.vmem (!%p115_p9), [#allocation2], %s392_s22 }
  0x10   : > { %s327_s30 = scalar_lea.hbm (!%p115_p9), %s666_s2, %s400_s25  ;;  %s316_s3 = scalar_lea.sflag (!%p115_p9), [#allocation3], %s132_s21 }
  0x11   : > { %s537_s5 = smov (!%p115_p9), [#allocation2]  }
  0x12   : > { %s477_s6 = sshll.u32 (!%p115_p9), %s537_s5, 4  ;;  %s478_s6 = int_to_ptr.vmem [resolvable:$false] %s477_s6 }
  0x13   : > { %v140_v0 = vld [vmem:[%s665_s1] sm:$0xff]  ;;  %v535_v1 = vmov 0.0   ;;  %vm536_vm0 = vmmov 0   ;;  %s136_s23 = scalar_select %p135_p10, %s574_s13, 7  ;;  %vm152_vm1 = vcmask 64512   ;;  %v145_v4 = vld [vmem:[%s665_s1 + $0x18] sm:$0xff] }
  0x14   : > { %410 = vmatprep.subr.mxu0 %v535_v1  ;;  %412 = vmatprep.mubr.msk.f32.mxu0 %vm536_vm0, %v535_v1  ;;  %v146_v3 = vld [vmem:[%s665_s1 + $0x20] sm:$0xff]  ;;  %v144_v5 = vld [vmem:[%s665_s1 + $0x10] sm:$0xff]  ;;  %v143_v6 = vld [vmem:[%s665_s1 + $0x8] sm:$0xff]  ;;  %vm231_vm2 = vcmask 261120   ;;  %s479_s13 = scalar_lea.vmem %s478_s6, 64 }
  0x15   : > { %411 = vmatpush3.msra.mxu0 %v140_v0  ;;  %415 = vmatprep.subr.mxu1 %v535_v1  ;;  %s393_s24 = sshll.u32 %s136_s23, 1  ;;  %v394_v7 = vld [vmem:[%s665_s1 + $0x6] ss:$0 sm:$0xff]  ;;  %v396_v12 = vld [vmem:[%s665_s1 + $0x28] ss:$0 sm:$0xff] }
  0x16   : > { %423 = vmatprep.mubr.msk.f32.mxu1 %vm536_vm0, %v535_v1  ;;  %s138_s27 = scalar_lea.vmem %s664_s0, %s393_s24  ;;  %416 = vmatpush3.msra.mxu1 %v146_v3  ;;  %v398_v19 = vld [vmem:[%s665_s1 + $0x7] ss:$0 sm:$0xff] }
  0x17   : > { %v139_v2 = vld [vmem:[%s138_s27] sm:$0x3]  ;;  %417 = vmatprep.subr.mxu1 %v535_v1  ;;  %s329_s27 = sshll.u32 %s134_s26, 4  ;;  %s330_s27 = int_to_ptr.vmem [resolvable:$true] %s329_s27 }
  0x18   : > { %413 = vmatmul.mubr.msk.f32.vlgmr.msra.gmra.mxu0 %vm152_vm1, %v139_v2  ;;  %418 = vmatpush3.msra.mxu1 %v145_v4  ;;  %s473_s4 = scalar_lea.vmem %s330_s27, 32  ;;  %p480_p0 = scmp.lt.s32.totalorder %s330_s27, %s478_s6 }
  0x19   : > { %419 = vmatprep.subr.mxu1 %v535_v1  ;;  %p474_p11 = scmp.ne.s32.totalorder %s330_s27, %s473_s4  ;;  %p481_p1 = scmp.lt.s32.totalorder %s479_s13, %s473_s4 }
  0x1a   : > { %420 = vmatpush3.msra.mxu1 %v144_v5 }
  0x1b   : > { %421 = vmatprep.subr.mxu1 %v535_v1  ;;  %p475_p12 = pnand %p474_p11, %p591_p5  ;;  %p482_p2 = por %p481_p1, %p480_p0 }
  0x1c   : > { %422 = vmatpush3.msra.mxu1 %v143_v6 }
  0x1d   : > { %p476_p13 = pneg %p475_p12 }
  0x1f   : > { %p483_p3 = pnand %p482_p2, %p476_p13 }
  0xd8   : > { %v222_v8 = vpop.f32.mrf.mxu0 }
  0xd9   : > { %v223_v9 = vadd.f32 %v394_v7, %v222_v8 }
  0xda   : > { %v414_v10 = vpop.f32.mrf.mxu0 }
  0xdb   : > { %467 = vtanh.f32 %v223_v9 }
  0xe8   : > { %v468_v11 = vpop.eup %467 }
  0xe9   : > { %424 = vmatmul.mubr.msk.f32.vlgmr.msra.gmra.mxu1 %vm231_vm2, %v468_v11 }
 0x1a9   : > { %v301_v13 = vpop.f32.mrf.mxu1 }
 0x1aa   : > { %v302_v14 = vadd.f32 %v396_v12, %v301_v13 }
 0x1ab   : > { %v425_v15 = vpop.f32.mrf.mxu1 }
 0x1ac   : > { %469 = vtanh.f32 %v302_v14 }
 0x1b9   : > { %v470_v16 = vpop.eup %469 }
 0x1ba   : > { %v306_v17 = vmul.f32 1.1512926, %v470_v16 }
 0x1bc   : > { %v307_v18 = vmul.f32 1.442695, %v306_v17 }
 0x1be   : > { %471 = vpow2.f32 %v307_v18 }
 0x1cb   : > { %v472_v20 = vpop.eup %471 }
 0x1cc   : > { %v313_v21 = vmul.f32 %v472_v20, %v398_v19 }
 0x1ce   : > { %314 = vst [vmem:[%s134_s26] sm:$0x3] %v313_v21 }
 0x1cf   : > { %486 = shalt.err (!%p483_p3)
}
 0x1d0   : > { %s487_s7 = scalar_lea.hbm %s327_s30, 32  ;;  %s491_s16 = scalar_lea.hbm %s666_s2, 256 }
 0x1d1   : > { %p488_p4 = scmp.ne.s32.totalorder %s327_s30, %s487_s7  ;;  %p492_p9 = scmp.lt.s32.totalorder %s327_s30, %s666_s2 }
 0x1d2   : > { %p493_p10 = scmp.lt.s32.totalorder %s491_s16, %s487_s7 }
 0x1d3   : > { %p489_p7 = pnand %p488_p4, %p591_p5 }
 0x1d4   : > { %p494_p11 = por %p493_p10, %p492_p9 }
 0x1d5   : > { %p490_p8 = pneg %p489_p7 }
 0x1d7   : > { %p495_p12 = pnand %p494_p11, %p490_p8 }
 0x1d9   : > { %498 = shalt.err (!%p495_p12)
}
 0x1da   : > { %426 = dma.vmem_to_hbm [thread:$0]  (%p591_p5), %s330_s27, 32, %s327_s30, %s316_s3  }
 0x1db PF: > { %p432_p13 = scmp.ge.s32.totalorder %s533_s12, 2  ;;  %s341_s22 = sand.u32 1, %s521_s9  }
 0x1dc   : > { %s342_s23 = scalar_lea.sflag [#allocation3], %s341_s22 }
 0x1dd   : > { %p429_p0 = pnand %p432_p13, %p595_p6 }
 0x1df   : > { %p430_p1 = pneg %p429_p0 }
 0x1e1   : > { %516 = dma.done.wait (%p430_p1), %s342_s23, 32  }
 0x1e2   : > { %518 = vsyncadd (%p430_p1), %s342_s23, 4294967264  ;;  %p12_p2 = scmp.ge.s32.totalorder %s578_s15, 10   ;;  %s669_s9 = smov %s525_s10 }
 0x1e3   : > { %s670_s10 = smov %s529_s11  ;;  %s671_s11 = smov %s589_s18 }
 0x1e4   : > { %s672_s12 = smov %s578_s15  ;;  %14 = sbr.rel (!%p12_p2) target bundleno = 3 (0x3), region = 63 }
 0x1e9   :  { %347 = vsyncpa [#allocation3], 1 }
 0x1ea   :  { %349 = vsyncpa [#allocation3 + $0x1], 1 }

</bundles_post_ra>
